<compile_context>
chip_gen: v7x
topology: tpu7x:2x2x1
jax: 0.10.0
libtpu: 0.0.40
codegen_flags: <defaults>
</compile_context>

<pallas_src>
import functools
import math

import jax
import jax.numpy as jnp
from jax.experimental import pallas as pl
from jax.experimental.pallas import tpu as pltpu

MAX_LENGTH = 500
_LANE = 128
_SMALL_FALLBACK_BYTES = 512 * 1024          # below this, plain XLA wins


# ---------------------------------------------------------------------------
# pe buffer construction (mirrors the PyTorch __init__, deterministic)
# ---------------------------------------------------------------------------
def make_pe(embed_size: int, max_length: int = MAX_LENGTH, dtype=jnp.float32):
    position = jnp.arange(max_length, dtype=jnp.float32)[:, None]          # (L, 1)
    div_term = jnp.exp(
        jnp.arange(0, embed_size, 2, dtype=jnp.float32)
        * (-math.log(10000.0) / embed_size)
    )                                                                       # (E/2,)
    ang = position * div_term                                               # (L, E/2)
    pe = jnp.zeros((max_length, 1, embed_size), dtype)
    pe = pe.at[:, 0, 0::2].set(jnp.sin(ang).astype(dtype))
    pe = pe.at[:, 0, 1::2].set(jnp.cos(ang).astype(dtype))
    return pe


# ---------------------------------------------------------------------------
# Kernels (shape-agnostic elementwise bodies; blocks chosen by the wrapper)
# ---------------------------------------------------------------------------
def _add_pe_kernel(x_ref, pe_ref, o_ref):
    o_ref[...] = (x_ref[...] + pe_ref[...]).astype(o_ref.dtype)


def _add_pe_dropout_kernel(x_ref, pe_ref, u_ref, o_ref, *, p):
    y = x_ref[...] + pe_ref[...]
    keep = u_ref[...] >= jnp.float32(p)                 # P(keep) = 1 - p
    scale = jnp.asarray(1.0 / (1.0 - p), y.dtype)       # inverted dropout
    o_ref[...] = jnp.where(keep, y * scale, jnp.zeros_like(y)).astype(o_ref.dtype)


# ---------------------------------------------------------------------------
# Wrapper
# ---------------------------------------------------------------------------
def positional_encoding(x, pe, *, dropout_p: float = 0.1, training: bool = False,
                        rng_key=None, target_block_bytes: int = 2 << 20,
                        force_pallas: bool = False):
    """Forward of PositionalEncoding.  x: (S, B, E); pe: (max_length, 1, E)."""
    S, B, E = x.shape
    itemsize = jnp.dtype(x.dtype).itemsize
    total_bytes = S * B * E * itemsize
    apply_dropout = training and dropout_p > 0.0

    # Tiny-input fast path: pallas_call launch + pipeline fill dwarfs the copy.
    if not force_pallas and total_bytes < _SMALL_FALLBACK_BYTES:
        y = x + pe[:S]
        if apply_dropout:
            keep = jax.random.bernoulli(rng_key, 1.0 - dropout_p, x.shape)
            y = jnp.where(keep, y / (1.0 - dropout_p), jnp.zeros_like(y))
        return y.astype(x.dtype)

    # ---- pick a lane-dense layout -----------------------------------------
    # Preferred: (ts, B, E) blocks with E on the lane axis (dense when E%128==0)
    # and a small (ts, 1, E) pe block broadcasting over batch (minimal traffic).
    # If E is lane-sparse but B*E is a 128-multiple, flatten to (S, B*E) and
    # pre-tile pe once so output stores are unmasked full-lane writes.
    if E % _LANE == 0 or (B * E) % _LANE != 0:
        flat = False
        x_in = x
        pe_in = pe[:S]                                   # (S, 1, E)
    else:
        flat = True
        x_in = x.reshape(S, B * E)                       # free (contiguous)
        pe_in = jnp.tile(pe[:S, 0, :], (1, B))           # (S, B*E), lane-dense

    # ~2 MiB x-blocks: >=85% of HBM roofline class on v5e/v6e and large enough
    # to amortize the ~0.35us/step overhead on v7x (3.2 TB/s), while the
    # double-buffered (x, [rand], out) blocks stay far under the 32 MiB scoped
    # VMEM default.  Tune target_block_bytes per generation if needed
    # (~1 MiB on v5e, 2-4 MiB on v7x).
    row_bytes = max(B * E * itemsize, 1)
    ts = max(1, min(S, target_block_bytes // row_bytes))
    if flat and ts != S:
        ts = max(8, (ts // 8) * 8)       # (8,128) rule: 2nd-minor dim of block
    grid = (pl.cdiv(S, ts),)

    if flat:
        x_spec = pl.BlockSpec((ts, B * E), lambda i: (i, 0))
        pe_spec = pl.BlockSpec((ts, B * E), lambda i: (i, 0))
        out_struct = jax.ShapeDtypeStruct((S, B * E), x.dtype)
    else:
        x_spec = pl.BlockSpec((ts, B, E), lambda i: (i, 0, 0))
        pe_spec = pl.BlockSpec((ts, 1, E), lambda i: (i, 0, 0))
        out_struct = jax.ShapeDtypeStruct((S, B, E), x.dtype)

    cparams = pltpu.CompilerParams(dimension_semantics=("parallel",))

    if not apply_dropout:
        out = pl.pallas_call(
            _add_pe_kernel,
            out_shape=out_struct,
            grid=grid,
            in_specs=[x_spec, pe_spec],
            out_specs=x_spec,
            compiler_params=cparams,
        )(x_in, pe_in)
    else:
        # TODO(synk): randomness comes from jax.random in the wrapper (one extra
        # HBM read); the in-kernel pltpu.prng_* path would avoid it but does not
        # lower in CPU interpret mode.  Distribution matches nn.Dropout
        # (keep prob 1-p, scale 1/(1-p)); not bitwise identical to torch's RNG.
        u = jax.random.uniform(rng_key, x_in.shape, dtype=jnp.float32)
        kernel = functools.partial(_add_pe_dropout_kernel, p=float(dropout_p))
        out = pl.pallas_call(
            kernel,
            out_shape=out_struct,
            grid=grid,
            in_specs=[x_spec, pe_spec, x_spec],
            out_specs=x_spec,
            compiler_params=cparams,
        )(x_in, pe_in, u)

    return out.reshape(S, B, E) if flat else out


# ---------------------------------------------------------------------------
# Main
# ---------------------------------------------------------------------------
if __name__ == "__main__":
    root = jax.random.PRNGKey(0)
    kx, kd = jax.random.split(root)

    # Case 1: lane-dense embed (E % 128 == 0) -> 3-D blocks, pe broadcast in-kernel.
    S, B, E = 8, 2, 128
    x = jax.random.normal(kx, (S, B, E), dtype=jnp.float32)
    pe = make_pe(E)
    ref = x + pe[:S]

    out_eval = jax.block_until_ready(
        positional_encoding(x, pe, dropout_p=0.1, training=False, force_pallas=True))
    assert out_eval.shape == (S, B, E)
    assert jnp.allclose(out_eval, ref, atol=1e-6, rtol=1e-6), "eval mismatch (3-D path)"

    out_train = jax.block_until_ready(
        positional_encoding(x, pe, dropout_p=0.1, training=True, rng_key=kd,
                            force_pallas=True))
    assert out_train.shape == (S, B, E)
    kept = out_train != 0.0
    scaled_ref = ref * jnp.float32(1.0 / (1.0 - 0.1))
    assert jnp.allclose(jnp.where(kept, out_train, 0.0),
                        jnp.where(kept, scaled_ref, 0.0),
                        atol=1e-5, rtol=1e-5), "train mismatch on kept elements"

    # Case 2: lane-sparse embed, flattened lane-dense path (B*E % 128 == 0).
    S2, B2, E2 = 8, 8, 32
    x2 = jax.random.normal(kx, (S2, B2, E2), dtype=jnp.float32)
    pe2 = make_pe(E2)
    ref2 = x2 + pe2[:S2]
    out2 = jax.block_until_ready(
        positional_encoding(x2, pe2, training=False, force_pallas=True))
    assert jnp.allclose(out2, ref2, atol=1e-6, rtol=1e-6), "eval mismatch (flat path)"

    # Case 3: tiny-input XLA fallback (no kernel launch).
    out_fb = jax.block_until_ready(positional_encoding(x2, pe2, training=False))
    assert jnp.allclose(out_fb, ref2, atol=1e-6, rtol=1e-6), "fallback mismatch"

    print("KERNEL_OK")
</pallas_src>

<mosaic_0001>
module attributes {stable_mosaic.version = 11 : i64} {
  func.func @_add_pe_kernel(%arg0: i32, %arg1: memref<8x2x128xf32, #tpu.memory_space<vmem>>, %arg2: memref<8x1x128xf32, #tpu.memory_space<vmem>>, %arg3: memref<8x2x128xf32, #tpu.memory_space<vmem>>) attributes {dimension_semantics = [#tpu.dimension_semantics<parallel>], iteration_bounds = array<i64: 1>, scalar_prefetch = 0 : i64, scratch_operands = 0 : i64, tpu.core_type = #tpu.core_type<tc>, window_params = [{transform_indices = @transform_0, window_bounds = array<i64: 8, 2, 128>}, {transform_indices = @transform_1, window_bounds = array<i64: 8, 1, 128>}, {transform_indices = @transform_2, window_bounds = array<i64: 8, 2, 128>}]} {
    %c0 = arith.constant 0 : index
    %c0_0 = arith.constant 0 : index
    %c0_1 = arith.constant 0 : index
    %0 = vector.load %arg1[%c0, %c0_0, %c0_1] : memref<8x2x128xf32, #tpu.memory_space<vmem>>, vector<8x2x128xf32>
    %c0_2 = arith.constant 0 : index
    %c0_3 = arith.constant 0 : index
    %c0_4 = arith.constant 0 : index
    %1 = vector.load %arg2[%c0_2, %c0_3, %c0_4] : memref<8x1x128xf32, #tpu.memory_space<vmem>>, vector<8x1x128xf32>
    %2 = vector.broadcast %1 : vector<8x1x128xf32> to vector<8x2x128xf32>
    %3 = arith.addf %0, %2 : vector<8x2x128xf32>
    %c0_5 = arith.constant 0 : index
    %c0_6 = arith.constant 0 : index
    %c0_7 = arith.constant 0 : index
    %4 = vector.load %arg3[%c0_5, %c0_6, %c0_7] : memref<8x2x128xf32, #tpu.memory_space<vmem>>, vector<8x2x128xf32>
    tpu.vector_store %arg3[%c0_5, %c0_6, %c0_7], %3 {strides = array<i32>} : memref<8x2x128xf32, #tpu.memory_space<vmem>>, vector<8x2x128xf32>,
    return
  }
  func.func @transform_0(%arg0: i32) -> (i32, i32, i32) {
    %c0_i32 = arith.constant 0 : i32
    %c0_i32_0 = arith.constant 0 : i32
    %c0_i32_1 = arith.constant 0 : i32
    return %arg0, %c0_i32, %c0_i32_0 : i32, i32, i32
  }
  func.func @transform_1(%arg0: i32) -> (i32, i32, i32) {
    %c0_i32 = arith.constant 0 : i32
    %c0_i32_0 = arith.constant 0 : i32
    %c0_i32_1 = arith.constant 0 : i32
    return %arg0, %c0_i32, %c0_i32_0 : i32, i32, i32
  }
  func.func @transform_2(%arg0: i32) -> (i32, i32, i32) {
    %c0_i32 = arith.constant 0 : i32
    %c0_i32_0 = arith.constant 0 : i32
    %c0_i32_1 = arith.constant 0 : i32
    return %arg0, %c0_i32, %c0_i32_0 : i32, i32, i32
  }
}

</mosaic_0001>

<bundles_post_ra>
// kernel: tpu_custom_call.1
= control target key start
LH: loop header
LB: loop body
LE: loop exit
PB: predicated region body
PF: predicated region fallthrough
CT: control target
= control target key end

     0   :  { %7 = vsyncpa [#allocation3], 0  ;;  %s292_s0 = inlined_call_operand.hbm [shape: f32[8,2,128], index: 0, kind: input, shape index: {}]   ;;  %s293_s1 = inlined_call_operand.hbm [shape: f32[8,1,128], index: 1, kind: input, shape index: {}]   ;;  %s294_s2 = inlined_call_operand.hbm [shape: f32[8,2,128], index: 2, kind: output, shape index: {}]  }
   0x1   :  { %8 = vsyncpa [#allocation6], 0 }
   0x2   :  { %9 = vsyncpa [#allocation4], 0  ;;  %s225_s9 = smov [#allocation2]   ;;  %s153_s13 = scalar_lea.hbm %s292_s0, 256 }
   0x3   :  { %s15_s10 = sshll.u32 %s225_s9, 4  ;;  %p154_p0 = scmp.ne.s32.totalorder %s292_s0, %s153_s13  ;;  %s16_s10 = int_to_ptr.vmem [resolvable:$true] %s15_s10 }
   0x4   :  { %p157_p1 = scmp.lt.u32.totalorder %s153_s13, %s292_s0 }
   0x6   :  { %p159_p2 = pnand %p157_p1, %p154_p0 }
   0x8   :  { %162 = shalt.err (!%p159_p2)
}
   0x9   :  { %s163_s18 = scalar_lea.vmem %s16_s10, 256  ;;  %p168_p4 = scmp.lt.s32.totalorder %s16_s10, %s16_s10 }
   0xa   :  { %p164_p3 = scmp.ne.s32.totalorder %s16_s10, %s163_s18  ;;  %p169_p5 = scmp.lt.s32.totalorder %s163_s18, %s163_s18 }
   0xc   :  { %p170_p6 = por %p169_p5, %p168_p4 }
   0xe   :  { %p171_p7 = pnand %p170_p6, %p164_p3 }
  0x10   :  { %174 = shalt.err (!%p171_p7)
}
  0x11   :  { %s226_s19 = smov 32   ;;  %s227_s20 = smov 2  }
  0x12   :  { %21 = dma.hbm_to_vmem [thread:$0]  %s292_s0, 256, %s16_s10, [#allocation3], %s226_s19, %s226_s19, %s227_s20  }
  0x13   :  { %s228_s23 = smov [#allocation5]   ;;  %s175_s27 = scalar_lea.hbm %s293_s1, 128 }
  0x14   :  { %s27_s24 = sshll.u32 %s228_s23, 4  ;;  %p176_p8 = scmp.ne.s32.totalorder %s293_s1, %s175_s27  ;;  %s28_s24 = int_to_ptr.vmem [resolvable:$true] %s27_s24 }
  0x15   :  { %p179_p9 = scmp.lt.u32.totalorder %s175_s27, %s293_s1 }
  0x17   :  { %p181_p10 = pnand %p179_p9, %p176_p8 }
  0x19   :  { %184 = shalt.err (!%p181_p10)
}
  0x1a   :  { %s185_s4 = scalar_lea.vmem %s28_s24, 128  ;;  %p190_p12 = scmp.lt.s32.totalorder %s28_s24, %s28_s24 }
  0x1b   :  { %p186_p11 = scmp.ne.s32.totalorder %s28_s24, %s185_s4  ;;  %p191_p13 = scmp.lt.s32.totalorder %s185_s4, %s185_s4 }
  0x1d   :  { %p192_p0 = por %p191_p13, %p190_p12 }
  0x1f   :  { %p193_p1 = pnand %p192_p0, %p186_p11 }
  0x21   :  { %196 = shalt.err (!%p193_p1)
}
  0x22   :  { %s229_s0 = smov 16   ;;  %s230_s5 = smov 1  }
  0x23   :  { %33 = dma.hbm_to_vmem [thread:$0]  %s293_s1, 128, %s28_s24, [#allocation6], %s229_s0, %s229_s0, %s230_s5  }
  0x24   :  { %219 = dma.done.wait [#allocation3], 256  }
  0x25   :  { %220 = vsyncadd [#allocation3], 4294967040 }
  0x26   :  { %221 = dma.done.wait [#allocation6], 128  }
  0x27   :  { %222 = vsyncadd [#allocation6], 4294967168  ;;  %s231_s8 = smov [#allocation7]   ;;  %v40_v0 = vld [vmem:[#allocation2] sm:$0x3] }
  0x28   :  { %s274_s9 = sshll.u32 %s231_s8, 4  ;;  %v138_v1 = vld [vmem:[#allocation5] ss:$0 sm:$0xff]  ;;  %v41_v2 = vld [vmem:[#allocation2 + $0x2] sm:$0x3]  ;;  %s126_s9 = int_to_ptr.vmem [resolvable:$true] %s274_s9 }
  0x29   :  { %v104_v3 = vadd.f32 %v138_v1, %v40_v0  ;;  %v139_v4 = vld [vmem:[#allocation5 + $0x1] ss:$0 sm:$0xff]  ;;  %v42_v5 = vld [vmem:[#allocation2 + $0x4] sm:$0x3]  ;;  %v140_v6 = vld [vmem:[#allocation5 + $0x2] ss:$0 sm:$0xff]  ;;  %p202_p3 = scmp.lt.s32.totalorder %s126_s9, %s126_s9 }
  0x2a   :  { %v105_v7 = vadd.f32 %v139_v4, %v41_v2  ;;  %v106_v8 = vadd.f32 %v140_v6, %v42_v5  ;;  %v43_v9 = vld [vmem:[#allocation2 + $0x6] sm:$0x3]  ;;  %v141_v10 = vld [vmem:[#allocation5 + $0x3] ss:$0 sm:$0xff]  ;;  %v44_v11 = vld [vmem:[#allocation2 + $0x8] sm:$0x3] }
  0x2b   :  { %112 = vst [vmem:[#allocation7] sm:$0x3] %v104_v3  ;;  %v107_v12 = vadd.f32 %v141_v10, %v43_v9  ;;  %v142_v13 = vld [vmem:[#allocation5 + $0x4] ss:$0 sm:$0xff]  ;;  %v45_v14 = vld [vmem:[#allocation2 + $0xa] sm:$0x3] }
  0x2c   :  { %v143_v15 = vld [vmem:[#allocation5 + $0x5] ss:$0 sm:$0xff]  ;;  %113 = vst [vmem:[#allocation7 + $0x2] sm:$0x3] %v105_v7  ;;  %114 = vst [vmem:[#allocation7 + $0x4] sm:$0x3] %v106_v8  ;;  %v108_v16 = vadd.f32 %v142_v13, %v44_v11 }
  0x2d   :  { %v109_v17 = vadd.f32 %v143_v15, %v45_v14  ;;  %v46_v18 = vld [vmem:[#allocation2 + $0xc] sm:$0x3]  ;;  %v144_v19 = vld [vmem:[#allocation5 + $0x6] ss:$0 sm:$0xff]  ;;  %v47_v20 = vld [vmem:[#allocation2 + $0xe] sm:$0x3] }
  0x2e   :  { %115 = vst [vmem:[#allocation7 + $0x6] sm:$0x3] %v107_v12  ;;  %v110_v21 = vadd.f32 %v144_v19, %v46_v18  ;;  %v145_v22 = vld [vmem:[#allocation5 + $0x7] ss:$0 sm:$0xff]  ;;  %116 = vst [vmem:[#allocation7 + $0x8] sm:$0x3] %v108_v16 }
  0x2f   :  { %117 = vst [vmem:[#allocation7 + $0xa] sm:$0x3] %v109_v17  ;;  %v111_v23 = vadd.f32 %v145_v22, %v47_v20  ;;  %s197_s1 = scalar_lea.vmem %s126_s9, 256 }
  0x30   :  { %118 = vst [vmem:[#allocation7 + $0xc] sm:$0x3] %v110_v21  ;;  %p198_p2 = scmp.ne.s32.totalorder %s126_s9, %s197_s1  ;;  %p203_p4 = scmp.lt.s32.totalorder %s197_s1, %s197_s1 }
  0x31   :  { %119 = vst [vmem:[#allocation7 + $0xe] sm:$0x3] %v111_v23 }
  0x32   :  { %p204_p5 = por %p203_p4, %p202_p3 }
  0x34   :  { %p205_p6 = pnand %p204_p5, %p198_p2 }
  0x36   :  { %208 = shalt.err (!%p205_p6)
}
  0x37   :  { %s209_s12 = scalar_lea.hbm %s294_s2, 256 }
  0x38   :  { %p210_p7 = scmp.ne.s32.totalorder %s294_s2, %s209_s12  ;;  %p213_p8 = scmp.lt.u32.totalorder %s209_s12, %s294_s2 }
  0x3a   :  { %p215_p9 = pnand %p213_p8, %p210_p7 }
  0x3c   :  { %218 = shalt.err (!%p215_p9)
}
  0x3d   :  { %131 = dma.vmem_to_hbm [thread:$0]  %s126_s9, 256, %s294_s2, [#allocation4], %s226_s19, %s226_s19, %s227_s20  }
  0x3e   :  { %223 = dma.done.wait [#allocation4], 256  }
  0x3f   :  { %224 = vsyncadd [#allocation4], 4294967040 }
  0x40   :  { %135 = vsyncpa [#allocation3], 1 }
  0x41   :  { %136 = vsyncpa [#allocation6], 1 }
  0x42   :  { %137 = vsyncpa [#allocation4], 1 }

</bundles_post_ra>
